<compile_context>
chip_gen: v7x
topology: tpu7x:2x2x1
jax: 0.10.0
libtpu: 0.0.40
codegen_flags: <defaults>
</compile_context>

<pallas_src>
import numpy as np
import jax
import jax.numpy as jnp
from jax.experimental import pallas as pl
from jax.experimental.pallas import tpu as pltpu

# ------------------------- problem configuration ---------------------------
BATCH = 2
SEQ = 8             # t
INPUT_SIZE = 32     # input_size
SIZE_PER_HEAD = 16  # size_per_head
NUM_HEADS = 4       # num_heads
NUM_UNITS = SIZE_PER_HEAD * NUM_HEADS
WINDOW = 64         # hard-coded `diagonal=64` in masking()
SCALE = float(NUM_UNITS) ** -0.5

# Precomputed additive mask over the head-stacked score axis (H*B*T = 64).
# Stacked index u = h*B*T + b*T + i  ->  block id u//T = h*B + b, position u%T = i.
_u = np.arange(NUM_HEADS * BATCH * SEQ)
_blk = _u // SEQ
_pos = _u % SEQ
_allowed = ((_blk[:, None] == _blk[None, :])                # same head & same batch
            & (_pos[None, :] <= _pos[:, None])              # causal
            & ((_pos[:, None] - _pos[None, :]) < WINDOW))   # diagonal=64 window
MASK_BIAS = np.where(_allowed, 0.0, -1e30).astype(np.float32)


def _mha_kernel(xq_ref, xk_ref, wq_ref, bq_ref, wk_ref, bk_ref, wv_ref, bv_ref,
                bias_ref, out_ref, p_ref):
    """Single-step kernel, entire problem resident in VMEM.

    xq_ref  : (B*T, IN)   query rows
    xk_ref  : (B*T, IN)   key rows
    w*_ref  : (IN, NU)    projection weights,  b*_ref : (1, NU)
    bias_ref: (H*B*T, H*B*T)  precomputed 0 / -1e30 additive mask
    out_ref : (B*T, NU)   attention output (heads concatenated on feature axis)
    p_ref   : (H*B*T, H*B*T)  head-stacked attention probabilities (lane-dense)
    """
    BT = BATCH * SEQ
    D = SIZE_PER_HEAD

    # Three small MXU projections (K=32 each).
    q = jnp.dot(xq_ref[...], wq_ref[...], preferred_element_type=jnp.float32) + bq_ref[...]
    k = jnp.dot(xk_ref[...], wk_ref[...], preferred_element_type=jnp.float32) + bk_ref[...]
    v = jnp.dot(xk_ref[...], wv_ref[...], preferred_element_type=jnp.float32) + bv_ref[...]

    # Relayout (BT, H*D) -> head-stacked (H*BT, D): rows [h*BT:(h+1)*BT] = head h.
    def to_heads(x):
        return jnp.concatenate(
            [x[:, h * D:(h + 1) * D] for h in range(NUM_HEADS)], axis=0)

    qh, kh, vh = to_heads(q), to_heads(k), to_heads(v)        # (H*BT, D)

    # Scores for ALL heads and batch elements in one MXU matmul: (H*BT, H*BT).
    s = jax.lax.dot_general(qh, kh, (((1,), (1,)), ((), ())),
                            preferred_element_type=jnp.float32)
    # Scale (reference rounding order) + precomputed additive mask.  Off-block entries
    # underflow to exactly 0 after the softmax, so the full-width contractions below are
    # exact per (head, batch) block.
    s = s * SCALE + bias_ref[...]

    # Softmax (every row keeps its diagonal entry -> no NaN possible).
    s_max = jnp.max(s, axis=-1, keepdims=True)
    e = jnp.exp(s - s_max)
    denom = jnp.sum(e, axis=-1, keepdims=True)
    # Exact reciprocal: approx=True (EUP vrcp) is only ~bf16-accurate and would risk
    # the 1e-5 check against the reference.
    p = e * pl.reciprocal(denom, approx=False)

    # Lane-dense store of the probabilities; (B,H,T,T) extraction happens in the wrapper.
    p_ref[...] = p

    # Context for all heads in one matmul: (H*BT, D).
    ctx = jnp.dot(p, vh, preferred_element_type=jnp.float32)

    # Back to (BT, H*D): heads concatenated along the feature axis in head order.
    out_ref[...] = jnp.concatenate(
        [ctx[h * BT:(h + 1) * BT, :] for h in range(NUM_HEADS)], axis=1)


@jax.jit
def masked_multihead_attention(queries, keys, wq, bq, wk, bk, wv, bv):
    B, T, IN = queries.shape
    assert (B, T, IN) == (BATCH, SEQ, INPUT_SIZE)
    BT = B * T

    xq = queries.reshape(BT, IN)   # contiguous reshape, no data movement
    xk = keys.reshape(BT, IN)

    vmem = pl.BlockSpec(memory_space=pltpu.MemorySpace.VMEM)
    out2d, p_full = pl.pallas_call(
        _mha_kernel,
        out_shape=(
            jax.ShapeDtypeStruct((BT, NUM_UNITS), jnp.float32),
            jax.ShapeDtypeStruct((NUM_HEADS * BT, NUM_HEADS * BT), jnp.float32),
        ),
        in_specs=[vmem] * 9,
        out_specs=(vmem, vmem),
    )(xq, xk,
      wq, bq.reshape(1, NUM_UNITS),
      wk, bk.reshape(1, NUM_UNITS),
      wv, bv.reshape(1, NUM_UNITS),
      jnp.asarray(MASK_BIAS))

    out = out2d.reshape(B, T, NUM_UNITS)

    # Extract per-(head, batch) diagonal (T, T) blocks -> (B, H, T, T) outside the kernel
    # (keeps the kernel's store lane-dense; this is a tiny XLA gather).
    p6 = p_full.reshape(NUM_HEADS, B, T, NUM_HEADS, B, T)
    h_idx = np.arange(NUM_HEADS)
    b_idx = np.arange(B)
    ph = p6[h_idx, :, :, h_idx, :, :]      # (H, B, T, B, T)
    attn = ph[:, b_idx, :, b_idx, :]       # (B, H, T, T)
    return out, attn


# ------------------------------ pure-JAX reference ---------------------------
def reference(queries, keys, wq, bq, wk, bk, wv, bv):
    q = queries @ wq + bq
    k = keys @ wk + bk
    v = keys @ wv + bv
    B, T, _ = q.shape

    def split_heads(x):
        return x.reshape(B, T, NUM_HEADS, SIZE_PER_HEAD).transpose(0, 2, 1, 3)

    q_, k_, v_ = split_heads(q), split_heads(k), split_heads(v)
    s = jnp.einsum("bhqd,bhkd->bhqk", q_, k_) * (NUM_UNITS ** -0.5)
    row = jnp.arange(T)[:, None]
    col = jnp.arange(T)[None, :]
    mask = jnp.logical_and(col <= row, (row - col) < WINDOW)
    s = jnp.where(mask[None, None], s, -jnp.inf)
    p = jax.nn.softmax(s, axis=-1)
    o = jnp.einsum("bhqk,bhkd->bhqd", p, v_)
    o = o.transpose(0, 2, 1, 3).reshape(B, T, NUM_UNITS)
    return o, p


if __name__ == "__main__":
    key = jax.random.PRNGKey(0)
    ks = jax.random.split(key, 8)
    queries = jax.random.normal(ks[0], (BATCH, SEQ, INPUT_SIZE), jnp.float32)
    keys_in = jax.random.normal(ks[1], (BATCH, SEQ, INPUT_SIZE), jnp.float32)

    # deterministic parameter init (shapes from nn.Linear(input_size, num_units))
    scale = 1.0 / (INPUT_SIZE ** 0.5)
    wq = jax.random.uniform(ks[2], (INPUT_SIZE, NUM_UNITS), jnp.float32, -scale, scale)
    wk = jax.random.uniform(ks[3], (INPUT_SIZE, NUM_UNITS), jnp.float32, -scale, scale)
    wv = jax.random.uniform(ks[4], (INPUT_SIZE, NUM_UNITS), jnp.float32, -scale, scale)
    bq = jax.random.uniform(ks[5], (NUM_UNITS,), jnp.float32, -scale, scale)
    bk = jax.random.uniform(ks[6], (NUM_UNITS,), jnp.float32, -scale, scale)
    bv = jax.random.uniform(ks[7], (NUM_UNITS,), jnp.float32, -scale, scale)

    out, attn = masked_multihead_attention(queries, keys_in, wq, bq, wk, bk, wv, bv)
    jax.block_until_ready((out, attn))

    out_ref, attn_ref = reference(queries, keys_in, wq, bq, wk, bk, wv, bv)
    assert jnp.allclose(out, out_ref, atol=1e-5, rtol=1e-5), "output mismatch"
    assert jnp.allclose(attn, attn_ref, atol=1e-5, rtol=1e-5), "attn mismatch"

    print("KERNEL_OK")
</pallas_src>

<mosaic_0001>
module attributes {stable_mosaic.version = 11 : i64} {
  func.func @_mha_kernel(%arg0: memref<16x32xf32, #tpu.memory_space<vmem>>, %arg1: memref<16x32xf32, #tpu.memory_space<vmem>>, %arg2: memref<32x64xf32, #tpu.memory_space<vmem>>, %arg3: memref<1x64xf32, #tpu.memory_space<vmem>>, %arg4: memref<32x64xf32, #tpu.memory_space<vmem>>, %arg5: memref<1x64xf32, #tpu.memory_space<vmem>>, %arg6: memref<32x64xf32, #tpu.memory_space<vmem>>, %arg7: memref<1x64xf32, #tpu.memory_space<vmem>>, %arg8: memref<64x64xf32, #tpu.memory_space<vmem>>, %arg9: memref<16x64xf32, #tpu.memory_space<vmem>>, %arg10: memref<64x64xf32, #tpu.memory_space<vmem>>) attributes {dimension_semantics = [], scalar_prefetch = 0 : i64, scratch_operands = 0 : i64, tpu.core_type = #tpu.core_type<tc>} {
    %c0 = arith.constant 0 : index
    %c0_0 = arith.constant 0 : index
    %0 = vector.load %arg0[%c0, %c0_0] : memref<16x32xf32, #tpu.memory_space<vmem>>, vector<16x32xf32>
    %c0_1 = arith.constant 0 : index
    %c0_2 = arith.constant 0 : index
    %1 = vector.load %arg2[%c0_1, %c0_2] : memref<32x64xf32, #tpu.memory_space<vmem>>, vector<32x64xf32>
    %cst = arith.constant dense<0.000000e+00> : vector<16x64xf32>
    %2 = tpu.matmul %0, %1, %cst {dimension_numbers = #tpu.dot_dimension_numbers<[1], [0], [0], [1], [0, 0, 1, 1], [], []>} : vector<16x32xf32>, vector<32x64xf32>, vector<16x64xf32> -> vector<16x64xf32>
    %c0_3 = arith.constant 0 : index
    %c0_4 = arith.constant 0 : index
    %3 = vector.load %arg3[%c0_3, %c0_4] : memref<1x64xf32, #tpu.memory_space<vmem>>, vector<1x64xf32>
    %4 = vector.broadcast %3 : vector<1x64xf32> to vector<16x64xf32>
    %5 = arith.addf %2, %4 : vector<16x64xf32>
    %c0_5 = arith.constant 0 : index
    %c0_6 = arith.constant 0 : index
    %6 = vector.load %arg1[%c0_5, %c0_6] : memref<16x32xf32, #tpu.memory_space<vmem>>, vector<16x32xf32>
    %c0_7 = arith.constant 0 : index
    %c0_8 = arith.constant 0 : index
    %7 = vector.load %arg4[%c0_7, %c0_8] : memref<32x64xf32, #tpu.memory_space<vmem>>, vector<32x64xf32>
    %cst_9 = arith.constant dense<0.000000e+00> : vector<16x64xf32>
    %8 = tpu.matmul %6, %7, %cst_9 {dimension_numbers = #tpu.dot_dimension_numbers<[1], [0], [0], [1], [0, 0, 1, 1], [], []>} : vector<16x32xf32>, vector<32x64xf32>, vector<16x64xf32> -> vector<16x64xf32>
    %c0_10 = arith.constant 0 : index
    %c0_11 = arith.constant 0 : index
    %9 = vector.load %arg5[%c0_10, %c0_11] : memref<1x64xf32, #tpu.memory_space<vmem>>, vector<1x64xf32>
    %10 = vector.broadcast %9 : vector<1x64xf32> to vector<16x64xf32>
    %11 = arith.addf %8, %10 : vector<16x64xf32>
    %c0_12 = arith.constant 0 : index
    %c0_13 = arith.constant 0 : index
    %12 = vector.load %arg1[%c0_12, %c0_13] : memref<16x32xf32, #tpu.memory_space<vmem>>, vector<16x32xf32>
    %c0_14 = arith.constant 0 : index
    %c0_15 = arith.constant 0 : index
    %13 = vector.load %arg6[%c0_14, %c0_15] : memref<32x64xf32, #tpu.memory_space<vmem>>, vector<32x64xf32>
    %cst_16 = arith.constant dense<0.000000e+00> : vector<16x64xf32>
    %14 = tpu.matmul %12, %13, %cst_16 {dimension_numbers = #tpu.dot_dimension_numbers<[1], [0], [0], [1], [0, 0, 1, 1], [], []>} : vector<16x32xf32>, vector<32x64xf32>, vector<16x64xf32> -> vector<16x64xf32>
    %c0_17 = arith.constant 0 : index
    %c0_18 = arith.constant 0 : index
    %15 = vector.load %arg7[%c0_17, %c0_18] : memref<1x64xf32, #tpu.memory_space<vmem>>, vector<1x64xf32>
    %16 = vector.broadcast %15 : vector<1x64xf32> to vector<16x64xf32>
    %17 = arith.addf %14, %16 : vector<16x64xf32>
    %18 = vector.extract_strided_slice %5 {offsets = [0, 0], sizes = [16, 16], strides = [1, 1]} : vector<16x64xf32> to vector<16x16xf32>
    %19 = vector.extract_strided_slice %5 {offsets = [0, 16], sizes = [16, 16], strides = [1, 1]} : vector<16x64xf32> to vector<16x16xf32>
    %20 = vector.extract_strided_slice %5 {offsets = [0, 32], sizes = [16, 16], strides = [1, 1]} : vector<16x64xf32> to vector<16x16xf32>
    %21 = vector.extract_strided_slice %5 {offsets = [0, 48], sizes = [16, 16], strides = [1, 1]} : vector<16x64xf32> to vector<16x16xf32>
    %22 = tpu.concatenate %18, %19, %20, %21 in 0 : vector<16x16xf32>, vector<16x16xf32>, vector<16x16xf32>, vector<16x16xf32> -> vector<64x16xf32>
    %23 = vector.extract_strided_slice %11 {offsets = [0, 0], sizes = [16, 16], strides = [1, 1]} : vector<16x64xf32> to vector<16x16xf32>
    %24 = vector.extract_strided_slice %11 {offsets = [0, 16], sizes = [16, 16], strides = [1, 1]} : vector<16x64xf32> to vector<16x16xf32>
    %25 = vector.extract_strided_slice %11 {offsets = [0, 32], sizes = [16, 16], strides = [1, 1]} : vector<16x64xf32> to vector<16x16xf32>
    %26 = vector.extract_strided_slice %11 {offsets = [0, 48], sizes = [16, 16], strides = [1, 1]} : vector<16x64xf32> to vector<16x16xf32>
    %27 = tpu.concatenate %23, %24, %25, %26 in 0 : vector<16x16xf32>, vector<16x16xf32>, vector<16x16xf32>, vector<16x16xf32> -> vector<64x16xf32>
    %28 = vector.extract_strided_slice %17 {offsets = [0, 0], sizes = [16, 16], strides = [1, 1]} : vector<16x64xf32> to vector<16x16xf32>
    %29 = vector.extract_strided_slice %17 {offsets = [0, 16], sizes = [16, 16], strides = [1, 1]} : vector<16x64xf32> to vector<16x16xf32>
    %30 = vector.extract_strided_slice %17 {offsets = [0, 32], sizes = [16, 16], strides = [1, 1]} : vector<16x64xf32> to vector<16x16xf32>
    %31 = vector.extract_strided_slice %17 {offsets = [0, 48], sizes = [16, 16], strides = [1, 1]} : vector<16x64xf32> to vector<16x16xf32>
    %32 = tpu.concatenate %28, %29, %30, %31 in 0 : vector<16x16xf32>, vector<16x16xf32>, vector<16x16xf32>, vector<16x16xf32> -> vector<64x16xf32>
    %cst_19 = arith.constant dense<0.000000e+00> : vector<64x64xf32>
    %33 = tpu.matmul %22, %27, %cst_19 {dimension_numbers = #tpu.dot_dimension_numbers<[1], [1], [0], [0], [0, 0, 1, 0], [], []>} : vector<64x16xf32>, vector<64x16xf32>, vector<64x64xf32> -> vector<64x64xf32>
    %cst_20 = arith.constant 1.250000e-01 : f32
    %34 = vector.broadcast %cst_20 : f32 to vector<64x64xf32>
    %35 = arith.mulf %33, %34 : vector<64x64xf32>
    %c0_21 = arith.constant 0 : index
    %c0_22 = arith.constant 0 : index
    %36 = vector.load %arg8[%c0_21, %c0_22] : memref<64x64xf32, #tpu.memory_space<vmem>>, vector<64x64xf32>
    %37 = arith.addf %35, %36 : vector<64x64xf32>
    %cst_23 = arith.constant dense<0xFF800000> : vector<64xf32>
    %38 = vector.multi_reduction <maximumf>, %37, %cst_23 [1] : vector<64x64xf32> to vector<64xf32>
    %39 = vector.shape_cast %38 : vector<64xf32> to vector<64x1xf32>
    %40 = vector.broadcast %39 : vector<64x1xf32> to vector<64x64xf32>
    %41 = arith.subf %37, %40 : vector<64x64xf32>
    %42 = math.exp %41 : vector<64x64xf32>
    %cst_24 = arith.constant dense<0.000000e+00> : vector<64xf32>
    %43 = vector.multi_reduction <add>, %42, %cst_24 [1] : vector<64x64xf32> to vector<64xf32>
    %44 = vector.shape_cast %43 : vector<64xf32> to vector<64x1xf32>
    %45 = tpu.reciprocal %44 : vector<64x1xf32> -> vector<64x1xf32>
    %46 = vector.broadcast %45 : vector<64x1xf32> to vector<64x64xf32>
    %47 = arith.mulf %42, %46 : vector<64x64xf32>
    %c0_25 = arith.constant 0 : index
    %c0_26 = arith.constant 0 : index
    %48 = vector.load %arg10[%c0_25, %c0_26] : memref<64x64xf32, #tpu.memory_space<vmem>>, vector<64x64xf32>
    tpu.vector_store %arg10[%c0_25, %c0_26], %47 {strides = array<i32>} : memref<64x64xf32, #tpu.memory_space<vmem>>, vector<64x64xf32>,
    %cst_27 = arith.constant dense<0.000000e+00> : vector<64x16xf32>
    %49 = tpu.matmul %47, %32, %cst_27 {dimension_numbers = #tpu.dot_dimension_numbers<[1], [0], [0], [1], [0, 0, 1, 1], [], []>} : vector<64x64xf32>, vector<64x16xf32>, vector<64x16xf32> -> vector<64x16xf32>
    %50 = vector.extract_strided_slice %49 {offsets = [0, 0], sizes = [16, 16], strides = [1, 1]} : vector<64x16xf32> to vector<16x16xf32>
    %51 = vector.extract_strided_slice %49 {offsets = [16, 0], sizes = [16, 16], strides = [1, 1]} : vector<64x16xf32> to vector<16x16xf32>
    %52 = vector.extract_strided_slice %49 {offsets = [32, 0], sizes = [16, 16], strides = [1, 1]} : vector<64x16xf32> to vector<16x16xf32>
    %53 = vector.extract_strided_slice %49 {offsets = [48, 0], sizes = [16, 16], strides = [1, 1]} : vector<64x16xf32> to vector<16x16xf32>
    %54 = tpu.concatenate %50, %51, %52, %53 in 1 : vector<16x16xf32>, vector<16x16xf32>, vector<16x16xf32>, vector<16x16xf32> -> vector<16x64xf32>
    %c0_28 = arith.constant 0 : index
    %c0_29 = arith.constant 0 : index
    %55 = vector.load %arg9[%c0_28, %c0_29] : memref<16x64xf32, #tpu.memory_space<vmem>>, vector<16x64xf32>
    tpu.vector_store %arg9[%c0_28, %c0_29], %54 {strides = array<i32>} : memref<16x64xf32, #tpu.memory_space<vmem>>, vector<16x64xf32>,
    return
  }
}

</mosaic_0001>

<bundles_post_ra>
// kernel: masked_multihead_attention.1
= control target key start
LH: loop header
LB: loop body
LE: loop exit
PB: predicated region body
PF: predicated region fallthrough
CT: control target
= control target key end

     0   :  { %16 = vsyncpa [#allocation3], 0  ;;  %s1626_s0 = inlined_call_operand.hbm [shape: f32[16,32], index: 0, kind: input, shape index: {}]   ;;  %s1627_s1 = inlined_call_operand.hbm [shape: f32[16,32], index: 1, kind: input, shape index: {}]   ;;  %s1628_s2 = inlined_call_operand.vmem [shape: f32[32,64], index: 2, kind: input, shape index: {}]   ;;  %s1629_s3 = inlined_call_operand.vmem [shape: f32[1,64], index: 3, kind: input, shape index: {}]   ;;  %s1630_s4 = inlined_call_operand.hbm [shape: f32[32,64], index: 4, kind: input, shape index: {}]   ;;  %s1631_s5 = inlined_call_operand.vmem [shape: f32[1,64], index: 5, kind: input, shape index: {}]   ;;  %s1632_s6 = inlined_call_operand.hbm [shape: f32[32,64], index: 6, kind: input, shape index: {}]   ;;  %s1633_s7 = inlined_call_operand.vmem [shape: f32[1,64], index: 7, kind: input, shape index: {}]   ;;  %s1634_s8 = inlined_call_operand.hbm [shape: f32[64,64], index: 8, kind: input, shape index: {}]   ;;  %s1635_s9 = inlined_call_operand.hbm [shape: f32[16,64], index: 9, kind: output, shape index: {0}]   ;;  %s1636_s10 = inlined_call_operand.vmem [shape: f32[64,64], index: 10, kind: output, shape index: {1}]  }
   0x1   :  { %17 = vsyncpa [#allocation6], 0 }
   0x2   :  { %18 = vsyncpa [#allocation9], 0 }
   0x3   :  { %19 = vsyncpa [#allocation4], 0  ;;  %s1322_s13 = smov [#allocation5]   ;;  %s1323_s15 = smov [#allocation8]  }
   0x4   :  { %s37_s14 = sshll.u32 %s1322_s13, 4  ;;  %s67_s16 = sshll.u32 %s1323_s15, 4  ;;  %s38_s14 = int_to_ptr.vmem [resolvable:$true] %s37_s14  ;;  %s1391_s16 = int_to_ptr.vmem [resolvable:$true] %s67_s16 }
   0x5   :  { %s1182_s19 = scalar_lea.hbm %s1627_s1, 256 }
   0x6   :  { %p1183_p0 = scmp.ne.s32.totalorder %s1627_s1, %s1182_s19  ;;  %p1186_p1 = scmp.lt.u32.totalorder %s1182_s19, %s1627_s1 }
   0x8   :  { %p1188_p2 = pnand %p1186_p1, %p1183_p0 }
   0xa   :  { %1191 = shalt.err (!%p1188_p2)
}
   0xb   :  { %s1192_s24 = scalar_lea.vmem %s38_s14, 256  ;;  %p1197_p4 = scmp.lt.s32.totalorder %s38_s14, %s38_s14 }
   0xc   :  { %p1193_p3 = scmp.ne.s32.totalorder %s38_s14, %s1192_s24  ;;  %p1198_p5 = scmp.lt.s32.totalorder %s1192_s24, %s1192_s24 }
   0xe   :  { %p1199_p6 = por %p1198_p5, %p1197_p4 }
  0x10   :  { %p1200_p7 = pnand %p1199_p6, %p1193_p3 }
  0x12   :  { %1203 = shalt.err (!%p1200_p7)
}
  0x13   :  { %s1324_s25 = smov 128   ;;  %s1325_s26 = smov 8  }
  0x14   :  { %43 = dma.hbm_to_vmem [thread:$0]  %s1627_s1, 256, %s38_s14, [#allocation6], %s1324_s25, %s1324_s25, %s1325_s26  }
  0x15   :  { %s1204_s11 = scalar_lea.hbm %s1632_s6, 512 }
  0x16   :  { %p1205_p8 = scmp.ne.s32.totalorder %s1632_s6, %s1204_s11  ;;  %p1208_p9 = scmp.lt.u32.totalorder %s1204_s11, %s1632_s6 }
  0x18   :  { %p1210_p10 = pnand %p1208_p9, %p1205_p8 }
  0x1a   :  { %1213 = shalt.err (!%p1210_p10)
}
  0x1b   :  { %s1214_s18 = scalar_lea.vmem %s1391_s16, 512  ;;  %p1219_p12 = scmp.lt.s32.totalorder %s1391_s16, %s1391_s16 }
  0x1c   :  { %p1215_p11 = scmp.ne.s32.totalorder %s1391_s16, %s1214_s18  ;;  %p1220_p13 = scmp.lt.s32.totalorder %s1214_s18, %s1214_s18 }
  0x1e   :  { %p1221_p0 = por %p1220_p13, %p1219_p12 }
  0x20   :  { %p1222_p1 = pnand %p1221_p0, %p1215_p11 }
  0x22   :  { %1225 = shalt.err (!%p1222_p1)
}
  0x23   :  { %73 = dma.hbm_to_vmem [thread:$0]  %s1632_s6, 512, %s1391_s16, [#allocation9], %s1324_s25, %s1324_s25, %s1325_s26  }
  0x24   :  { %s1326_s19 = smov [#allocation2]   ;;  %s1327_s21 = smov [#allocation7]  }
  0x25   :  { %s25_s20 = sshll.u32 %s1326_s19, 4  ;;  %s53_s22 = sshll.u32 %s1327_s21, 4  ;;  %s26_s20 = int_to_ptr.vmem [resolvable:$true] %s25_s20  ;;  %s1428_s22 = int_to_ptr.vmem [resolvable:$true] %s53_s22 }
  0x26   :  { %s1226_s27 = scalar_lea.hbm %s1626_s0, 256 }
  0x27   :  { %p1227_p2 = scmp.ne.s32.totalorder %s1626_s0, %s1226_s27  ;;  %p1230_p3 = scmp.lt.u32.totalorder %s1226_s27, %s1626_s0 }
  0x29   :  { %p1232_p4 = pnand %p1230_p3, %p1227_p2 }
  0x2b   :  { %1235 = shalt.err (!%p1232_p4)
}
  0x2c   :  { %s1236_s6 = scalar_lea.vmem %s26_s20, 256  ;;  %p1241_p6 = scmp.lt.s32.totalorder %s26_s20, %s26_s20 }
  0x2d   :  { %p1237_p5 = scmp.ne.s32.totalorder %s26_s20, %s1236_s6  ;;  %p1242_p7 = scmp.lt.s32.totalorder %s1236_s6, %s1236_s6 }
  0x2f   :  { %p1243_p8 = por %p1242_p7, %p1241_p6 }
  0x31   :  { %p1244_p9 = pnand %p1243_p8, %p1237_p5 }
  0x33   :  { %1247 = shalt.err (!%p1244_p9)
}
  0x34   :  { %31 = dma.hbm_to_vmem [thread:$0]  %s1626_s0, 256, %s26_s20, [#allocation3], %s1324_s25, %s1324_s25, %s1325_s26  }
  0x35   :  { %s1248_s17 = scalar_lea.hbm %s1630_s4, 512 }
  0x36   :  { %p1249_p10 = scmp.ne.s32.totalorder %s1630_s4, %s1248_s17  ;;  %p1252_p11 = scmp.lt.u32.totalorder %s1248_s17, %s1630_s4 }
  0x38   :  { %p1254_p12 = pnand %p1252_p11, %p1249_p10 }
  0x3a   :  { %1257 = shalt.err (!%p1254_p12)
}
  0x3b   :  { %s1258_s21 = scalar_lea.vmem %s1428_s22, 512  ;;  %p1263_p0 = scmp.lt.s32.totalorder %s1428_s22, %s1428_s22 }
  0x3c   :  { %p1259_p13 = scmp.ne.s32.totalorder %s1428_s22, %s1258_s21  ;;  %p1264_p1 = scmp.lt.s32.totalorder %s1258_s21, %s1258_s21 }
  0x3e   :  { %p1265_p2 = por %p1264_p1, %p1263_p0 }
  0x40   :  { %p1266_p3 = pnand %p1265_p2, %p1259_p13 }
  0x42   :  { %1269 = shalt.err (!%p1266_p3)
}
  0x43   :  { %59 = dma.hbm_to_vmem [thread:$0]  %s1630_s4, 512, %s1428_s22, [#allocation6], %s1324_s25, %s1324_s25, %s1325_s26  }
  0x44   :  { %s1328_s23 = smov [#allocation10]   ;;  %s1270_s29 = scalar_lea.hbm %s1634_s8, 1024 }
  0x45   :  { %s81_s24 = sshll.u32 %s1328_s23, 4  ;;  %p1271_p4 = scmp.ne.s32.totalorder %s1634_s8, %s1270_s29  ;;  %s82_s24 = int_to_ptr.vmem [resolvable:$true] %s81_s24 }
  0x46   :  { %p1274_p5 = scmp.lt.u32.totalorder %s1270_s29, %s1634_s8 }
  0x48   :  { %p1276_p6 = pnand %p1274_p5, %p1271_p4 }
  0x4a   :  { %1279 = shalt.err (!%p1276_p6)
}
  0x4b   :  { %s1280_s12 = scalar_lea.vmem %s82_s24, 1024  ;;  %p1285_p8 = scmp.lt.s32.totalorder %s82_s24, %s82_s24 }
  0x4c   :  { %p1281_p7 = scmp.ne.s32.totalorder %s82_s24, %s1280_s12  ;;  %p1286_p9 = scmp.lt.s32.totalorder %s1280_s12, %s1280_s12 }
  0x4e   :  { %p1287_p10 = por %p1286_p9, %p1285_p8 }
  0x50   :  { %p1288_p11 = pnand %p1287_p10, %p1281_p7 }
  0x52   :  { %1291 = shalt.err (!%p1288_p11)
}
  0x53   :  { %87 = dma.hbm_to_vmem [thread:$0]  %s1634_s8, 1024, %s82_s24, [#allocation9], %s1324_s25, %s1324_s25, %s1325_s26  }
  0x54   :  { %1314 = dma.done.wait [#allocation3], 256  }
  0x55   :  { %1315 = vsyncadd [#allocation3], 4294967040 }
  0x56   :  { %1316 = dma.done.wait [#allocation6], 768  }
  0x57   :  { %1317 = vsyncadd [#allocation6], 4294966528 }
  0x58   :  { %1318 = dma.done.wait [#allocation9], 1536  }
  0x59   :  { %1319 = vsyncadd [#allocation9], 4294965760  ;;  %vm116_vm0 = vcmask 261120   ;;  %v200_v0 = vld [vmem:[#allocation7] sm:$0xff]  ;;  %v201_v1 = vld [vmem:[#allocation7 + $0x8] sm:$0xff]  ;;  %vm426_vm1 = vcmask 130048  }
  0x5a   :  { %v202_v2 = vld [vmem:[#allocation7 + $0x10] sm:$0xff]  ;;  %v1050_v3 = vpack.c.bf16 %v201_v1, %v200_v0  ;;  %v203_v4 = vld [vmem:[#allocation7 + $0x18] sm:$0xff]  ;;  %v105_v7 = vld [vmem:[%s1628_s2] sm:$0xff]  ;;  %s1330_s23 = smov 112   ;;  %vm588_vm3 = vcmask 523264   ;;  %s1333_s14 = smov 32  }
  0x5b   :  { %v198_v5 = vld [vmem:[#allocation5] sm:$0xff]  ;;  %v1054_v6 = vpack.c.bf16 %v203_v4, %v202_v2  ;;  %v106_v8 = vld [vmem:[%s1628_s2 + $0x8] sm:$0xff]  ;;  %v108_v11 = vld [vmem:[%s1628_s2 + $0x18] sm:$0xff]  ;;  %s1334_s19 = smov 48   ;;  %vm842_vm4 = vcmask 392192  }
  0x5c   :  { %972 = vmatprep.mubr.msk.f32.mxu1 %vm116_vm0, %v198_v5  ;;  %v107_v9 = vld [vmem:[%s1628_s2 + $0x10] sm:$0xff]  ;;  %1051 = vmatprep.subr.bf16.mxu1 %v1050_v3  ;;  %v1042_v10 = vpack.c.bf16 %v106_v8, %v105_v7  ;;  %v103_v12 = vld [vmem:[#allocation2] sm:$0xff]  ;;  %v199_v14 = vld [vmem:[#allocation5 + $0x8] sm:$0xff]  ;;  %s1335_s2 = smov [#allocation11]  }
  0x5d   :  { %1053 = vmatpush3.bf16.msra.mxu1 %v1050_v3  ;;  %v1046_v13 = vpack.c.bf16 %v108_v11, %v107_v9  ;;  %961 = vmatprep.mubr.msk.f32.mxu0 %vm116_vm0, %v103_v12  ;;  %v104_v15 = vld [vmem:[#allocation2 + $0x8] sm:$0xff]  ;;  %v873_v16 = vld [vmem:[%s1631_s5] ss:$0 sm:$0xff]  ;;  %vm1505_vm2 = vmpackc.low %vm426_vm1, %vm426_vm1  ;;  %s1329_s5 = smov 80   ;;  %s852_s21 = sshll.u32 %s1335_s2, 4  ;;  %s853_s21 = int_to_ptr.vmem [resolvable:$true] %s852_s21 }
  0x5e   :  { %1055 = vmatprep.subr.bf16.mxu1 %v1054_v6  ;;  %1043 = vmatprep.subr.bf16.mxu0 %v1042_v10  ;;  %v870_v22 = vld [vmem:[%s1629_s3] ss:$0 sm:$0xff]  ;;  %s1331_s3 = smov 96   ;;  %v293_v30 = vld [vmem:[#allocation8 + $0x8] sm:$0xff]  ;;  %v294_v31 = vld [vmem:[#allocation8 + $0x10] sm:$0xff]  ;;  %s1292_s0 = scalar_lea.vmem %s853_s21, 256 }
  0x5f   :  { %1045 = vmatpush3.bf16.msra.mxu0 %v1042_v10  ;;  %v292_v29 = vld [vmem:[#allocation8] sm:$0xff]  ;;  %v295_v33 = vld [vmem:[#allocation8 + $0x18] sm:$0xff]  ;;  %v573_v54 = vld [vmem:[#allocation10 + $0x8] sm:$0xff]  ;;  %p1293_p12 = scmp.ne.s32.totalorder %s853_s21, %s1292_s0  ;;  %p1297_p13 = scmp.lt.s32.totalorder %s853_s21, %s853_s21 }
  0x60   :  { %1047 = vmatprep.subr.bf16.mxu0 %v1046_v13  ;;  %v1058_v32 = vpack.c.bf16 %v293_v30, %v292_v29  ;;  %v1062_v34 = vpack.c.bf16 %v295_v33, %v294_v31  ;;  %v572_v57 = vld [vmem:[#allocation10] sm:$0xff]  ;;  %v575_v62 = vld [vmem:[#allocation10 + $0x18] sm:$0xff]  ;;  %v574_v2 = vld [vmem:[#allocation10 + $0x10] sm:$0xff]  ;;  %p1298_p0 = scmp.lt.s32.totalorder %s1292_s0, %s1292_s0 }
  0x61   :  { %1057 = vmatpush3.bf16.msra.mxu1 %v1054_v6  ;;  %v577_v8 = vld [vmem:[#allocation10 + $0x28] sm:$0xff]  ;;  %v576_v12 = vld [vmem:[#allocation10 + $0x20] sm:$0xff] }
  0x62   :  { %v876_v30 = vld [vmem:[%s1633_s7] ss:$0 sm:$0xff]  ;;  %p1299_p1 = por %p1298_p0, %p1297_p13 }
  0x63   :  { %1049 = vmatpush3.bf16.msra.mxu0 %v1046_v13 }
  0x64   :  { %973 = vmatmul.mubr.msk.f32.vlgmr.msra.gmra.mrb[0].mxu1 %vm116_vm0, %v199_v14  ;;  %1059 = vmatprep.subr.bf16.mxu0 %v1058_v32  ;;  %p1300_p2 = pnand %p1299_p1, %p1293_p12 }
  0x66   :  { %962 = vmatmul.mubr.msk.f32.vlgmr.msra.gmra.mrb[0].mxu0 %vm116_vm0, %v104_v15 }
  0x67   :  { %983 = vmatprep.mubr.msk.f32.mxu0 %vm116_vm0, %v198_v5  ;;  %1061 = vmatpush3.bf16.msra.mxu0 %v1058_v32 }
  0x68   :  { %1063 = vmatprep.subr.bf16.mxu0 %v1062_v34 }
  0x6b   :  { %1065 = vmatpush3.bf16.msra.mxu0 %v1062_v34 }
  0x6e   :  { %984 = vmatmul.mubr.msk.f32.vlgmr.msra.gmra.mrb[2].mxu0 %vm116_vm0, %v199_v14 }
 0x137   :  { %v974_v17 = vpop.f32.mrb[0].mxu1 }
 0x138   :  { %v289_v18 = vadd.f32 %v974_v17, %v873_v16  ;;  %v283_v19 = vpop.f32.mrb[1].mxu1 }
 0x139   :  { %v284_v20 = vadd.f32 %v873_v16, %v283_v19  ;;  %v963_v21 = vpop.f32.mrb[0].mxu0 }
 0x13a   :  { %v189_v23 = vpop.f32.mrb[1].mxu0  ;;  %v195_v28 = vadd.f32 %v963_v21, %v870_v22  ;;  %v578_v21 = vld [vmem:[#allocation10 + $0x30] sm:$0xff] }
 0x13b   :  { %v1130_v24 = vpack.i.bf16 %v289_v18, %v284_v20  ;;  %v1066_v25 = vpack.c.bf16 %v289_v18, %v284_v20  ;;  %v190_v27 = vadd.f32 %v870_v22, %v189_v23  ;;  %v579_v18 = vld [vmem:[#allocation10 + $0x38] sm:$0xff] }
 0x13d   :  { %1131 = vrot.lane.b32.xlu1 %v1130_v24, %s1329_s5  ;;  %1121 = vrot.lane.b32.xlu0 %v1130_v24, %s1330_s23 }
 0x13e   :  { %1068 = vmatprep.subr.msk.bf16.mxu1 %vm1505_vm2, %v1066_v25  ;;  %1002 = vmatprep.mubr.msk.f32.mxu1 %vm426_vm1, %v190_v27 }
 0x13f   :  { %1071 = vmatpush3.bf16.xpose.msk.msra.mxu1 %vm1505_vm2, %v1066_v25 }
 0x141   :  { %1126 = vrot.lane.b32.xlu0 %v1130_v24, %s1331_s3  ;;  %380 = vrot.lane.b32.xlu1 %v190_v27, %s1330_s23  ;;  %v985_v29 = vpop.f32.mrb[2].mxu0 }
 0x142   :  { %v375_v31 = vadd.f32 %v985_v29, %v876_v30  ;;  %v369_v32 = vpop.f32.mrb[3].mxu0 }
 0x143   :  { %v370_v33 = vadd.f32 %v876_v30, %v369_v32 }
 0x145   :  { %382 = vrot.lane.b32.xlu0 %v195_v28, %s1330_s23  ;;  %384 = vrot.lane.b32.xlu1 %v190_v27, %s1331_s3  ;;  %v1140_v34 = vpack.i.bf16 %v375_v31, %v370_v33 }
 0x149   :  { %386 = vrot.lane.b32.xlu0 %v195_v28, %s1331_s3  ;;  %388 = vrot.lane.b32.xlu1 %v190_v27, %s1329_s5 }
 0x14d   :  { %390 = vrot.lane.b32.xlu0 %v195_v28, %s1329_s5 }
 0x1af   :  { %v1122_v35 = vpop.permute.xlu0 %1121  ;;  %v1132_v42 = vpop.permute.xlu1 %1131 }
 0x1b0   :  { %v1124_v36 = vunpack.i.h.bf16 %v1122_v35  ;;  %v1123_v37 = vunpack.i.l.bf16 %v1122_v35  ;;  %v1134_v44 = vunpack.i.h.bf16 %v1132_v42  ;;  %v1133_v45 = vunpack.i.l.bf16 %v1132_v42 }
 0x1b1   :  { %v1090_v35 = vpack.c.bf16 %v375_v31, %v370_v33 }
 0x1b2   :  { %v1072_v38 = vpack.c.bf16 %v1124_v36, %v1123_v37  ;;  %v1084_v46 = vpack.c.bf16 %v1134_v44, %v1133_v45 }
 0x1b3   :  { %v1127_v39 = vpop.permute.xlu0 %1126  ;;  %v381_v47 = vpop.permute.xlu1 %380  ;;  %1091 = vmatprep.subr.bf16.mxu0 %v1090_v35 }
 0x1b4   :  { %v1129_v40 = vunpack.i.h.bf16 %v1127_v39  ;;  %v1128_v41 = vunpack.i.l.bf16 %v1127_v39  ;;  %1074 = vmatprep.subr.msk.bf16.mxu1 %vm1505_vm2, %v1072_v38  ;;  %1093 = vmatpush3.bf16.msra.mxu0 %v1090_v35 }
 0x1b5   :  { %1077 = vmatpush3.bf16.xpose.msk.msra.mxu1 %vm1505_vm2, %v1072_v38 }
 0x1b6   :  { %v1078_v43 = vpack.c.bf16 %v1129_v40, %v1128_v41 }
 0x1b7   :  { %v383_v48 = vpop.permute.xlu0 %382  ;;  %v385_v49 = vpop.permute.xlu1 %384 }
 0x1b8   :  { %1080 = vmatprep.subr.msk.bf16.mxu1 %vm1505_vm2, %v1078_v43 }
 0x1bb   :  { %v387_v50 = vpop.permute.xlu0 %386  ;;  %v389_v51 = vpop.permute.xlu1 %388 }
 0x1bd   :  { %1083 = vmatpush3.bf16.xpose.msk.msra.mxu1 %vm1505_vm2, %v1078_v43 }
 0x1be   :  { %1086 = vmatprep.subr.msk.bf16.mxu1 %vm1505_vm2, %v1084_v46 }
 0x1bf   :  { %v391_v52 = vpop.permute.xlu0 %390 }
 0x1c5   :  { %1089 = vmatpush3.bf16.xpose.msk.msra.mxu1 %vm1505_vm2, %v1084_v46 }
 0x1cc   :  { %1003 = vmatmul.mubr.msk.f32.vlgmr.msra.gmra.mrb[2].mxu1 %vm426_vm1, %v195_v28 }
 0x1cd   :  { %1005 = vmatprep.mubr.msk.f32.mxu1 %vm426_vm1, %v381_v47 }
 0x1d0   :  { %1006 = vmatmul.mubr.msk.f32.gmra.mrb[4].mxu1 %vm426_vm1, %v383_v48 }
 0x1d1   :  { %1008 = vmatprep.mubr.msk.f32.mxu1 %vm426_vm1, %v385_v49 }
 0x1d4   :  { %1009 = vmatmul.mubr.msk.f32.gmra.mrb[6].mxu1 %vm426_vm1, %v387_v50 }
 0x1d5   :  { %1011 = vmatprep.mubr.msk.f32.mxu1 %vm426_vm1, %v389_v51 }
 0x1d8   :  { %1012 = vmatmul.mubr.msk.f32.gmra.mrb[8].mxu1 %vm426_vm1, %v391_v52 }
 0x29f   :  { %v1004_v53 = vpop.f32.mrb[2].mxu1 }
 0x2a0   :  { %v565_v55 = vmul.f32 0.125, %v1004_v53  ;;  %v525_v56 = vpop.f32.mrb[3].mxu1 }
 0x2a1   :  { %v564_v58 = vmul.f32 0.125, %v525_v56 }
 0x2a2   :  { %v581_v59 = vadd.f32 %v573_v54, %v565_v55 }
 0x2a3   :  { %v1007_v60 = vpop.f32.mrb[4].mxu1  ;;  %v580_v61 = vadd.f32 %v572_v57, %v564_v58 }
 0x2a4   :  { %v567_v63 = vmul.f32 0.125, %v1007_v60  ;;  %v535_v0 = vpop.f32.mrb[5].mxu1  ;;  %v592_v1 = vsel %vm588_vm3, %v581_v59, -inf }
 0x2a5   :  { %v566_v3 = vmul.f32 0.125, %v535_v0  ;;  %593 = vmax.xlane.f32.xlu0 %v592_v1  ;;  %v589_v4 = vsel %vm588_vm3, %v580_v61, -inf }
 0x2a6   :  { %590 = vmax.xlane.f32.xlu1 %v589_v4  ;;  %v583_v5 = vadd.f32 %v575_v62, %v567_v63 }
 0x2a7   :  { %v1010_v6 = vpop.f32.mrb[6].mxu1  ;;  %v582_v7 = vadd.f32 %v574_v2, %v566_v3 }
 0x2a8   :  { %v569_v9 = vmul.f32 0.125, %v1010_v6  ;;  %v545_v10 = vpop.f32.mrb[7].mxu1  ;;  %v598_v11 = vsel %vm588_vm3, %v583_v5, -inf }
 0x2a9   :  { %v568_v13 = vmul.f32 0.125, %v545_v10  ;;  %v595_v14 = vsel %vm588_vm3, %v582_v7, -inf }
 0x2aa   :  { %599 = vmax.xlane.f32.xlu1 %v598_v11  ;;  %596 = vmax.xlane.f32.xlu0 %v595_v14  ;;  %v585_v15 = vadd.f32 %v577_v8, %v569_v9 }
 0x2ab   :  { %v1013_v16 = vpop.f32.mrb[8].mxu1  ;;  %v584_v17 = vadd.f32 %v576_v12, %v568_v13 }
 0x2ac   :  { %v571_v19 = vmul.f32 0.125, %v1013_v16  ;;  %v555_v20 = vpop.f32.mrb[9].mxu1  ;;  %v604_v22 = vsel %vm588_vm3, %v585_v15, -inf }
 0x2ad   :  { %v570_v23 = vmul.f32 0.125, %v555_v20  ;;  %v601_v24 = vsel %vm588_vm3, %v584_v17, -inf }
 0x2ae   :  { %605 = vmax.xlane.f32.xlu1 %v604_v22  ;;  %602 = vmax.xlane.f32.xlu0 %v601_v24  ;;  %v587_v25 = vadd.f32 %v579_v18, %v571_v19 }
 0x2af   :  { %v586_v26 = vadd.f32 %v578_v21, %v570_v23 }
 0x2b0   :  { %v610_v27 = vsel %vm588_vm3, %v587_v25, -inf }
 0x2b1   :  { %v607_v28 = vsel %vm588_vm3, %v586_v26, -inf }
 0x2b2   :  { %611 = vmax.xlane.f32.xlu1 %v610_v27  ;;  %608 = vmax.xlane.f32.xlu0 %v607_v28 }
 0x332   :  { %v594_v36 = vpop.xlane.xlu0 %593 }
 0x333   :  { %v614_v37 = vsub.f32 %v581_v59, %v594_v36  ;;  %v591_v38 = vpop.xlane.xlu1 %590 }
 0x334   :  { %v613_v39 = vsub.f32 %v580_v61, %v591_v38 }
 0x335   :  { %v623_v40 = vmul.f32 1.442695, %v614_v37 }
 0x336   :  { %v621_v41 = vmul.f32 1.442695, %v613_v39 }
 0x337   :  { %1150 = vpow2.f32 %v623_v40  ;;  %v600_v42 = vpop.xlane.xlu1 %599  ;;  %v597_v43 = vpop.xlane.xlu0 %596 }
 0x338   :  { %1152 = vpow2.f32 %v621_v41  ;;  %v616_v44 = vsub.f32 %v583_v5, %v600_v42  ;;  %v615_v45 = vsub.f32 %v582_v7, %v597_v43 }
 0x33a   :  { %v627_v46 = vmul.f32 1.442695, %v616_v44  ;;  %v625_v47 = vmul.f32 1.442695, %v615_v45 }
 0x33b   :  { %v606_v48 = vpop.xlane.xlu1 %605  ;;  %v603_v49 = vpop.xlane.xlu0 %602 }
 0x33c   :  { %1154 = vpow2.f32 %v627_v46  ;;  %v618_v50 = vsub.f32 %v585_v15, %v606_v48  ;;  %v617_v51 = vsub.f32 %v584_v17, %v603_v49 }
 0x33d   :  { %1156 = vpow2.f32 %v625_v47 }
 0x33e   :  { %v631_v52 = vmul.f32 1.442695, %v618_v50  ;;  %v629_v53 = vmul.f32 1.442695, %v617_v51 }
 0x33f   :  { %v612_v54 = vpop.xlane.xlu1 %611  ;;  %v609_v55 = vpop.xlane.xlu0 %608 }
 0x340   :  { %1158 = vpow2.f32 %v631_v52  ;;  %v620_v56 = vsub.f32 %v587_v25, %v612_v54  ;;  %v619_v57 = vsub.f32 %v586_v26, %v609_v55 }
 0x341   :  { %v1151_v58 = vpop.eup %1150  ;;  %1160 = vpow2.f32 %v629_v53 }
 0x342   :  { %v1153_v59 = vpop.eup %1152  ;;  %v635_v60 = vmul.f32 1.442695, %v620_v56  ;;  %v633_v61 = vmul.f32 1.442695, %v619_v57  ;;  %v640_v62 = vsel %vm588_vm3, %v1151_v58, 0.0 }
 0x343   :  { %641 = vadd.xlane.f32.xlu1 %v640_v62  ;;  %v637_v63 = vsel %vm588_vm3, %v1153_v59, 0.0 }
 0x344   :  { %1162 = vpow2.f32 %v635_v60  ;;  %638 = vadd.xlane.f32.xlu0 %v637_v63 }
 0x345   :  { %1164 = vpow2.f32 %v633_v61 }
 0x346   :  { %v1155_v0 = vpop.eup %1154 }
 0x347   :  { %v1157_v1 = vpop.eup %1156  ;;  %v646_v2 = vsel %vm588_vm3, %v1155_v0, 0.0 }
 0x348   :  { %647 = vadd.xlane.f32.xlu1 %v646_v2  ;;  %v643_v3 = vsel %vm588_vm3, %v1157_v1, 0.0 }
 0x349   :  { %644 = vadd.xlane.f32.xlu0 %v643_v3 }
 0x34a   :  { %v1159_v4 = vpop.eup %1158 }
 0x34b   :  { %v1161_v5 = vpop.eup %1160  ;;  %v652_v6 = vsel %vm588_vm3, %v1159_v4, 0.0 }
 0x34c   :  { %653 = vadd.xlane.f32.xlu1 %v652_v6  ;;  %v649_v7 = vsel %vm588_vm3, %v1161_v5, 0.0 }
 0x34d   :  { %650 = vadd.xlane.f32.xlu0 %v649_v7 }
 0x34e   :  { %v1163_v8 = vpop.eup %1162 }
 0x34f   :  { %v1165_v9 = vpop.eup %1164  ;;  %v658_v10 = vsel %vm588_vm3, %v1163_v8, 0.0 }
 0x350   :  { %659 = vadd.xlane.f32.xlu1 %v658_v10  ;;  %v655_v11 = vsel %vm588_vm3, %v1165_v9, 0.0 }
 0x351   :  { %656 = vadd.xlane.f32.xlu0 %v655_v11 }
 0x361   :  { %1141 = vrot.lane.b32.xlu1 %v1140_v34, %s1331_s3 }
 0x365   :  { %1146 = vrot.lane.b32.xlu1 %v1140_v34, %s1329_s5 }
 0x367   :  { %1136 = vrot.lane.b32.xlu0 %v1140_v34, %s1330_s23 }
 0x3d0   :  { %v642_v12 = vpop.xlane.xlu1 %641 }
 0x3d1   :  { %1166 = vrcp.f32 %v642_v12  ;;  %v639_v13 = vpop.xlane.xlu0 %638 }
 0x3d2   :  { %1168 = vrcp.f32 %v639_v13 }
 0x3d5   :  { %v648_v14 = vpop.xlane.xlu1 %647 }
 0x3d6   :  { %1170 = vrcp.f32 %v648_v14  ;;  %v645_v15 = vpop.xlane.xlu0 %644 }
 0x3d7   :  { %1172 = vrcp.f32 %v645_v15 }
 0x3d9   :  { %v654_v16 = vpop.xlane.xlu1 %653 }
 0x3da   :  { %1174 = vrcp.f32 %v654_v16  ;;  %v651_v17 = vpop.xlane.xlu0 %650 }
 0x3db   :  { %v1167_v18 = vpop.eup %1166  ;;  %1176 = vrcp.f32 %v651_v17 }
 0x3dc   :  { %v1169_v19 = vpop.eup %1168  ;;  %v670_v20 = vmul.f32 %v1167_v18, %v1151_v58 }
 0x3dd   :  { %v660_v21 = vpop.xlane.xlu1 %659  ;;  %v669_v22 = vmul.f32 %v1169_v19, %v1153_v59 }
 0x3de   :  { %678 = vst.msk [vmem:[%s1636_s10 + $0x8] sm:$0xff] %vm588_vm3, %v670_v20  ;;  %1178 = vrcp.f32 %v660_v21  ;;  %v657_v23 = vpop.xlane.xlu0 %656 }
 0x3df   :  { %1180 = vrcp.f32 %v657_v23  ;;  %677 = vst.msk [vmem:[%s1636_s10] sm:$0xff] %vm588_vm3, %v669_v22  ;;  %1030 = vmatprep.mubr.msk.f32.mxu0 %vm588_vm3, %v669_v22 }
 0x3e0   :  { %v1171_v24 = vpop.eup %1170 }
 0x3e1   :  { %v1173_v25 = vpop.eup %1172  ;;  %v1142_v26 = vpop.permute.xlu1 %1141  ;;  %v672_v27 = vmul.f32 %v1171_v24, %v1155_v0 }
 0x3e2   :  { %v1137_v28 = vpop.permute.xlu0 %1136  ;;  %v671_v29 = vmul.f32 %v1173_v25, %v1157_v1  ;;  %v1144_v30 = vunpack.i.h.bf16 %v1142_v26  ;;  %v1143_v31 = vunpack.i.l.bf16 %v1142_v26 }
 0x3e3   :  { %v1139_v32 = vunpack.i.h.bf16 %v1137_v28  ;;  %v1138_v33 = vunpack.i.l.bf16 %v1137_v28  ;;  %680 = vst.msk [vmem:[%s1636_s10 + $0x18] sm:$0xff] %vm588_vm3, %v672_v27 }
 0x3e4   :  { %v1175_v34 = vpop.eup %1174  ;;  %679 = vst.msk [vmem:[%s1636_s10 + $0x10] sm:$0xff] %vm588_vm3, %v671_v29  ;;  %v1098_v40 = vpack.c.bf16 %v1144_v30, %v1143_v31 }
 0x3e5   :  { %v1177_v35 = vpop.eup %1176  ;;  %v1094_v36 = vpack.c.bf16 %v1139_v32, %v1138_v33  ;;  %v1147_v37 = vpop.permute.xlu1 %1146  ;;  %v674_v38 = vmul.f32 %v1175_v34, %v1159_v4 }
 0x3e6   :  { %v673_v39 = vmul.f32 %v1177_v35, %v1161_v5  ;;  %v1149_v41 = vunpack.i.h.bf16 %v1147_v37  ;;  %v1148_v42 = vunpack.i.l.bf16 %v1147_v37 }
 0x3e7   :  { %1095 = vmatprep.subr.bf16.mxu0 %v1094_v36  ;;  %682 = vst.msk [vmem:[%s1636_s10 + $0x28] sm:$0xff] %vm588_vm3, %v674_v38 }
 0x3e8   :  { %v1179_v43 = vpop.eup %1178  ;;  %1097 = vmatpush3.bf16.msra.mxu0 %v1094_v36  ;;  %681 = vst.msk [vmem:[%s1636_s10 + $0x20] sm:$0xff] %vm588_vm3, %v673_v39  ;;  %v1102_v47 = vpack.c.bf16 %v1149_v41, %v1148_v42 }
 0x3e9   :  { %v1181_v44 = vpop.eup %1180  ;;  %1099 = vmatprep.subr.bf16.mxu0 %v1098_v40  ;;  %v676_v45 = vmul.f32 %v1179_v43, %v1163_v8 }
 0x3ea   :  { %v675_v46 = vmul.f32 %v1181_v44, %v1165_v9 }
 0x3eb   :  { %684 = vst.msk [vmem:[%s1636_s10 + $0x38] sm:$0xff] %vm588_vm3, %v676_v45 }
 0x3ec   :  { %1101 = vmatpush3.bf16.msra.mxu0 %v1098_v40  ;;  %683 = vst.msk [vmem:[%s1636_s10 + $0x30] sm:$0xff] %vm588_vm3, %v675_v46  ;;  %s1332_s10 = smov 16  }
 0x3ed   :  { %1103 = vmatprep.subr.bf16.mxu0 %v1102_v47 }
 0x3f0   :  { %1105 = vmatpush3.bf16.msra.mxu0 %v1102_v47 }
 0x3f3   :  { %1031 = vmatmul.mubr.msk.f32.vlgmr.msra.gmra.mrb[4].mxu0 %vm588_vm3, %v670_v20 }
 0x3f4   :  { %1033 = vmatprep.mubr.msk.f32.mxu0 %vm588_vm3, %v671_v29 }
 0x3f7   :  { %1034 = vmatmul.mubr.msk.f32.gmra.mrb[6].mxu0 %vm588_vm3, %v672_v27 }
 0x3f8   :  { %1036 = vmatprep.mubr.msk.f32.mxu0 %vm588_vm3, %v673_v39 }
 0x3fb   :  { %1037 = vmatmul.mubr.msk.f32.gmra.mrb[8].mxu0 %vm588_vm3, %v674_v38 }
 0x3fc   :  { %1039 = vmatprep.mubr.msk.f32.mxu0 %vm588_vm3, %v675_v46 }
 0x3ff   :  { %1040 = vmatmul.mubr.msk.f32.gmra.mrb[10].mxu0 %vm588_vm3, %v676_v45 }
 0x4c6   :  { %v1032_v48 = vpop.f32.mrb[4].mxu0 }
 0x4c7   :  { %v775_v49 = vpop.f32.mrb[5].mxu0 }
 0x4ca   :  { %v1035_v50 = vpop.f32.mrb[6].mxu0 }
 0x4cb   :  { %818 = vrot.lane.b32.xlu1 %v1035_v50, %s1332_s10  ;;  %v785_v51 = vpop.f32.mrb[7].mxu0 }
 0x4cc   :  { %816 = vrot.lane.b32.xlu0 %v785_v51, %s1332_s10 }
 0x4ce   :  { %v1038_v52 = vpop.f32.mrb[8].mxu0 }
 0x4cf   :  { %826 = vrot.lane.b32.xlu1 %v1038_v52, %s1333_s14  ;;  %v795_v53 = vpop.f32.mrb[9].mxu0 }
 0x4d0   :  { %824 = vrot.lane.b32.xlu0 %v795_v53, %s1333_s14 }
 0x4d2   :  { %v1041_v54 = vpop.f32.mrb[10].mxu0 }
 0x4d3   :  { %834 = vrot.lane.b32.xlu1 %v1041_v54, %s1334_s19  ;;  %v805_v55 = vpop.f32.mrb[11].mxu0 }
 0x4d4   :  { %832 = vrot.lane.b32.xlu0 %v805_v55, %s1334_s19 }
 0x53d   :  { %v819_v56 = vpop.permute.xlu1 %818 }
 0x53e   :  { %v817_v57 = vpop.permute.xlu0 %816  ;;  %v839_v60 = vsel %vm426_vm1, %v1032_v48, %v819_v56 }
 0x53f   :  { %v838_v61 = vsel %vm426_vm1, %v775_v49, %v817_v57 }
 0x541   :  { %v827_v58 = vpop.permute.xlu1 %826 }
 0x542   :  { %v825_v59 = vpop.permute.xlu0 %824  ;;  %v841_v62 = vsel %vm116_vm0, %v839_v60, %v827_v58 }
 0x543   :  { %v840_v0 = vsel %vm116_vm0, %v838_v61, %v825_v59 }
 0x545   :  { %v835_v63 = vpop.permute.xlu1 %834 }
 0x546   :  { %v844_v1 = vsel %vm842_vm4, %v841_v62, %v835_v63  ;;  %v833_v2 = vpop.permute.xlu0 %832 }
 0x547   :  { %846 = vst.msk [vmem:[#allocation11 + $0x8] sm:$0xff] %vm588_vm3, %v844_v1  ;;  %v843_v3 = vsel %vm842_vm4, %v840_v0, %v833_v2 }
 0x548   :  { %845 = vst.msk [vmem:[#allocation11] sm:$0xff] %vm588_vm3, %v843_v3 }
 0x549   :  { %1303 = shalt.err (!%p1300_p2)
}
 0x54a   :  { %s1304_s23 = scalar_lea.hbm %s1635_s9, 256 }
 0x54b   :  { %p1305_p3 = scmp.ne.s32.totalorder %s1635_s9, %s1304_s23  ;;  %p1308_p4 = scmp.lt.u32.totalorder %s1304_s23, %s1635_s9 }
 0x54d   :  { %p1310_p5 = pnand %p1308_p4, %p1305_p3 }
 0x54f   :  { %1313 = shalt.err (!%p1310_p5)
}
 0x550   :  { %858 = dma.vmem_to_hbm [thread:$0]  %s853_s21, 256, %s1635_s9, [#allocation4], %s1324_s25, %s1324_s25, %s1325_s26  }
 0x551   :  { %1320 = dma.done.wait [#allocation4], 256  }
 0x552   :  { %1321 = vsyncadd [#allocation4], 4294967040 }
 0x553   :  { %866 = vsyncpa [#allocation3], 1 }
 0x554   :  { %867 = vsyncpa [#allocation6], 1 }
 0x555   :  { %868 = vsyncpa [#allocation9], 1 }
 0x556   :  { %869 = vsyncpa [#allocation4], 1 }

</bundles_post_ra>
